<compile_context>
chip_gen: v7x
topology: tpu7x:2x2x1
jax: 0.10.0
libtpu: 0.0.40
codegen_flags: <defaults>
</compile_context>

<pallas_src>
import jax
import jax.numpy as jnp
from jax.experimental import pallas as pl
from jax.experimental.pallas import tpu as pltpu

_BLUR_SCALE = 1.0 / 20.0  # matches the PyTorch module's /20


def _blur_kernel(x_ref, o_ref):
    # x_ref / o_ref: (BC, H, W) blocks (full spatial extent, BC channel maps).
    # Separable [1,2,1] (x) [1,2,1] stencil with an in-kernel zero halo.
    x = x_ref[...].astype(jnp.float32)
    bc, h, w = x.shape

    # Horizontal pass: x[j-1] + 2*x[j] + x[j+1], zero outside [0, W).
    zc = jnp.zeros((bc, h, 1), jnp.float32)
    left = jnp.concatenate([zc, x[:, :, :-1]], axis=2)
    right = jnp.concatenate([x[:, :, 1:], zc], axis=2)
    hpass = left + 2.0 * x + right

    # Vertical pass: h[i-1] + 2*h[i] + h[i+1], zero outside [0, H).
    zr = jnp.zeros((bc, 1, w), jnp.float32)
    up = jnp.concatenate([zr, hpass[:, :-1, :]], axis=1)
    down = jnp.concatenate([hpass[:, 1:, :], zr], axis=1)
    out = (up + 2.0 * hpass + down) * _BLUR_SCALE

    o_ref[...] = out.astype(o_ref.dtype)


def _pick_block_channels(nc, h, w, itemsize, vmem_budget_bytes=8 << 20):
    """Largest divisor of nc whose (input+output, double-buffered) block fits
    the VMEM budget."""
    bytes_per_map = 2 * h * w * itemsize * 2  # (in + out) * double-buffer
    bc_cap = max(1, vmem_budget_bytes // bytes_per_map)
    bc_cap = int(min(bc_cap, nc))
    for bc in range(bc_cap, 0, -1):
        if nc % bc == 0:
            return bc
    return 1


def blur(x):
    """Depthwise 3x3 blur, padding=1, stride=1. x: (N, C, H, W)."""
    N, C, H, W = x.shape
    nc = N * C
    xf = x.reshape(nc, H, W)

    bc = _pick_block_channels(nc, H, W, x.dtype.itemsize)
    grid = (nc // bc,)

    out = pl.pallas_call(
        _blur_kernel,
        out_shape=jax.ShapeDtypeStruct((nc, H, W), x.dtype),
        grid=grid,
        # Block covers the full (H, W) extent, so the last-two-dims tiling
        # constraint is satisfied for any H, W; only the channel axis is tiled.
        in_specs=[pl.BlockSpec((bc, H, W), lambda i: (i, 0, 0))],
        out_specs=pl.BlockSpec((bc, H, W), lambda i: (i, 0, 0)),
        compiler_params=pltpu.CompilerParams(
            dimension_semantics=("parallel",),
            vmem_limit_bytes=64 << 20,
        ),
    )(xf)
    return out.reshape(N, C, H, W)


def _blur_reference(x):
    """Pure-JAX reference: grouped conv identical to F.conv2d in the module."""
    N, C, H, W = x.shape
    k = jnp.asarray([[1.0, 2.0, 1.0],
                     [2.0, 4.0, 2.0],
                     [1.0, 2.0, 1.0]], jnp.float32) * _BLUR_SCALE
    k = jnp.broadcast_to(k[None, None], (C, 1, 3, 3))  # (O, I/groups, kH, kW)
    return jax.lax.conv_general_dilated(
        x.astype(jnp.float32), k,
        window_strides=(1, 1), padding=((1, 1), (1, 1)),
        dimension_numbers=("NCHW", "OIHW", "NCHW"),
        feature_group_count=C).astype(x.dtype)


if __name__ == "__main__":
    key = jax.random.PRNGKey(0)
    N, C, H, W = 2, 4, 16, 16
    x = jax.random.normal(key, (N, C, H, W), dtype=jnp.float32)

    y = jax.block_until_ready(blur(x))
    y_ref = jax.block_until_ready(_blur_reference(x))

    assert y.shape == (N, C, H, W), y.shape
    assert jnp.allclose(y, y_ref, atol=1e-5, rtol=1e-5), (
        float(jnp.max(jnp.abs(y - y_ref))))
    print("KERNEL_OK")
</pallas_src>

<mosaic_0001>
module attributes {stable_mosaic.version = 11 : i64} {
  func.func @_blur_kernel(%arg0: i32, %arg1: memref<8x16x16xf32, #tpu.memory_space<vmem>>, %arg2: memref<8x16x16xf32, #tpu.memory_space<vmem>>) attributes {dimension_semantics = [#tpu.dimension_semantics<parallel>], iteration_bounds = array<i64: 1>, scalar_prefetch = 0 : i64, scratch_operands = 0 : i64, tpu.core_type = #tpu.core_type<tc>, window_params = [{transform_indices = @transform_0, window_bounds = array<i64: 8, 16, 16>}, {transform_indices = @transform_1, window_bounds = array<i64: 8, 16, 16>}]} {
    %c0 = arith.constant 0 : index
    %c0_0 = arith.constant 0 : index
    %c0_1 = arith.constant 0 : index
    %0 = vector.load %arg1[%c0, %c0_0, %c0_1] : memref<8x16x16xf32, #tpu.memory_space<vmem>>, vector<8x16x16xf32>
    %cst = arith.constant 0.000000e+00 : f32
    %1 = vector.broadcast %cst : f32 to vector<8x16x1xf32>
    %2 = vector.extract_strided_slice %0 {offsets = [0, 0, 0], sizes = [8, 16, 15], strides = [1, 1, 1]} : vector<8x16x16xf32> to vector<8x16x15xf32>
    %3 = tpu.concatenate %1, %2 in 2 : vector<8x16x1xf32>, vector<8x16x15xf32> -> vector<8x16x16xf32>
    %4 = vector.extract_strided_slice %0 {offsets = [0, 0, 1], sizes = [8, 16, 15], strides = [1, 1, 1]} : vector<8x16x16xf32> to vector<8x16x15xf32>
    %5 = tpu.concatenate %4, %1 in 2 : vector<8x16x15xf32>, vector<8x16x1xf32> -> vector<8x16x16xf32>
    %cst_2 = arith.constant 2.000000e+00 : f32
    %6 = vector.broadcast %cst_2 : f32 to vector<8x16x16xf32>
    %7 = arith.mulf %6, %0 : vector<8x16x16xf32>
    %8 = arith.addf %3, %7 : vector<8x16x16xf32>
    %9 = arith.addf %8, %5 : vector<8x16x16xf32>
    %cst_3 = arith.constant 0.000000e+00 : f32
    %10 = vector.broadcast %cst_3 : f32 to vector<8x1x16xf32>
    %11 = vector.extract_strided_slice %9 {offsets = [0, 0, 0], sizes = [8, 15, 16], strides = [1, 1, 1]} : vector<8x16x16xf32> to vector<8x15x16xf32>
    %12 = tpu.concatenate %10, %11 in 1 : vector<8x1x16xf32>, vector<8x15x16xf32> -> vector<8x16x16xf32>
    %13 = vector.extract_strided_slice %9 {offsets = [0, 1, 0], sizes = [8, 15, 16], strides = [1, 1, 1]} : vector<8x16x16xf32> to vector<8x15x16xf32>
    %14 = tpu.concatenate %13, %10 in 1 : vector<8x15x16xf32>, vector<8x1x16xf32> -> vector<8x16x16xf32>
    %cst_4 = arith.constant 2.000000e+00 : f32
    %15 = vector.broadcast %cst_4 : f32 to vector<8x16x16xf32>
    %16 = arith.mulf %15, %9 : vector<8x16x16xf32>
    %17 = arith.addf %12, %16 : vector<8x16x16xf32>
    %18 = arith.addf %17, %14 : vector<8x16x16xf32>
    %cst_5 = arith.constant 5.000000e-02 : f32
    %19 = vector.broadcast %cst_5 : f32 to vector<8x16x16xf32>
    %20 = arith.mulf %18, %19 : vector<8x16x16xf32>
    %c0_6 = arith.constant 0 : index
    %c0_7 = arith.constant 0 : index
    %c0_8 = arith.constant 0 : index
    %21 = vector.load %arg2[%c0_6, %c0_7, %c0_8] : memref<8x16x16xf32, #tpu.memory_space<vmem>>, vector<8x16x16xf32>
    tpu.vector_store %arg2[%c0_6, %c0_7, %c0_8], %20 {strides = array<i32>} : memref<8x16x16xf32, #tpu.memory_space<vmem>>, vector<8x16x16xf32>,
    return
  }
  func.func @transform_0(%arg0: i32) -> (i32, i32, i32) {
    %c0_i32 = arith.constant 0 : i32
    %c0_i32_0 = arith.constant 0 : i32
    %c0_i32_1 = arith.constant 0 : i32
    return %arg0, %c0_i32, %c0_i32_0 : i32, i32, i32
  }
  func.func @transform_1(%arg0: i32) -> (i32, i32, i32) {
    %c0_i32 = arith.constant 0 : i32
    %c0_i32_0 = arith.constant 0 : i32
    %c0_i32_1 = arith.constant 0 : i32
    return %arg0, %c0_i32, %c0_i32_0 : i32, i32, i32
  }
}

</mosaic_0001>

<bundles_post_ra>
// kernel: tpu_custom_call.1
= control target key start
LH: loop header
LB: loop body
LE: loop exit
PB: predicated region body
PF: predicated region fallthrough
CT: control target
= control target key end

     0   :  { %6 = vsyncpa [#allocation3], 0  ;;  %s667_s0 = inlined_call_operand.hbm [shape: f32[8,16,16], index: 0, kind: input, shape index: {}]   ;;  %s668_s1 = inlined_call_operand.hbm [shape: f32[8,16,16], index: 1, kind: output, shape index: {}]  }
   0x1   :  { %7 = vsyncpa [#allocation4], 0  ;;  %s499_s6 = smov [#allocation2]   ;;  %s451_s10 = scalar_lea.hbm %s667_s0, 2048 }
   0x2   :  { %s13_s7 = sshll.u32 %s499_s6, 4  ;;  %p452_p0 = scmp.ne.s32.totalorder %s667_s0, %s451_s10  ;;  %s14_s7 = int_to_ptr.vmem [resolvable:$true] %s13_s7 }
   0x3   :  { %p455_p1 = scmp.lt.u32.totalorder %s451_s10, %s667_s0 }
   0x5   :  { %p457_p2 = pnand %p455_p1, %p452_p0 }
   0x7   :  { %460 = shalt.err (!%p457_p2)
}
   0x8   :  { %s461_s15 = scalar_lea.vmem %s14_s7, 2048  ;;  %p466_p4 = scmp.lt.s32.totalorder %s14_s7, %s14_s7 }
   0x9   :  { %p462_p3 = scmp.ne.s32.totalorder %s14_s7, %s461_s15  ;;  %p467_p5 = scmp.lt.s32.totalorder %s461_s15, %s461_s15 }
   0xb   :  { %p468_p6 = por %p467_p5, %p466_p4 }
   0xd   :  { %p469_p7 = pnand %p468_p6, %p462_p3 }
   0xf   :  { %472 = shalt.err (!%p469_p7)
}
  0x10   :  { %s500_s16 = smov 128   ;;  %s501_s17 = smov 8  }
  0x11   :  { %19 = dma.hbm_to_vmem [thread:$0]  %s667_s0, 2048, %s14_s7, [#allocation3], %s500_s16, %s500_s16, %s501_s17  }
  0x12   :  { %495 = dma.done.wait [#allocation3], 2048  }
  0x13   :  { %496 = vsyncadd [#allocation3], 4294965248  ;;  %v25_v0 = vld [vmem:[#allocation2 + $0x10] sm:$0xff]  ;;  %v23_v1 = vld [vmem:[#allocation2] sm:$0xff]  ;;  %s502_s20 = smov 1   ;;  %s503_s0 = smov 127  }
  0x14   :  { %59 = vrot.lane.b32.xlu1 %v25_v0, %s502_s20  ;;  %55 = vrot.lane.b32.xlu0 %v23_v1, %s502_s20  ;;  %v26_v2 = vld [vmem:[#allocation2 + $0x18] sm:$0xff]  ;;  %v24_v3 = vld [vmem:[#allocation2 + $0x8] sm:$0xff]  ;;  %v27_v5 = vld [vmem:[#allocation2 + $0x20] sm:$0xff]  ;;  %vm103_vm0 = vcmask 7168   ;;  %v187_v28 = vmul.f32 2.0, %v25_v0  ;;  %v185_v29 = vmul.f32 2.0, %v23_v1 }
  0x15   :  { %v28_v4 = vld [vmem:[#allocation2 + $0x28] sm:$0xff]  ;;  %v30_v6 = vld [vmem:[#allocation2 + $0x38] sm:$0xff]  ;;  %v29_v7 = vld [vmem:[#allocation2 + $0x30] sm:$0xff]  ;;  %v188_v30 = vmul.f32 2.0, %v26_v2  ;;  %v186_v31 = vmul.f32 2.0, %v24_v3  ;;  %v189_v33 = vmul.f32 2.0, %v27_v5 }
  0x16   :  { %v32_v8 = vld [vmem:[#allocation2 + $0x48] sm:$0xff]  ;;  %v31_v9 = vld [vmem:[#allocation2 + $0x40] sm:$0xff]  ;;  %v34_v10 = vld [vmem:[#allocation2 + $0x58] sm:$0xff]  ;;  %v190_v32 = vmul.f32 2.0, %v28_v4  ;;  %v192_v34 = vmul.f32 2.0, %v30_v6  ;;  %v191_v35 = vmul.f32 2.0, %v29_v7 }
  0x17   :  { %v33_v11 = vld [vmem:[#allocation2 + $0x50] sm:$0xff]  ;;  %v36_v12 = vld [vmem:[#allocation2 + $0x68] sm:$0xff]  ;;  %v35_v13 = vld [vmem:[#allocation2 + $0x60] sm:$0xff]  ;;  %v194_v38 = vmul.f32 2.0, %v32_v8  ;;  %v193_v39 = vmul.f32 2.0, %v31_v9  ;;  %v196_v40 = vmul.f32 2.0, %v34_v10 }
  0x18   :  { %61 = vrot.lane.b32.xlu1 %v26_v2, %s502_s20  ;;  %57 = vrot.lane.b32.xlu0 %v24_v3, %s502_s20  ;;  %v38_v14 = vld [vmem:[#allocation2 + $0x78] sm:$0xff]  ;;  %v37_v15 = vld [vmem:[#allocation2 + $0x70] sm:$0xff]  ;;  %v195_v41 = vmul.f32 2.0, %v33_v11  ;;  %v198_v44 = vmul.f32 2.0, %v36_v12  ;;  %v197_v45 = vmul.f32 2.0, %v35_v13  ;;  %vm168_vm1 = vcmask 121856  }
  0x19   :  { %v534_v48 = vmul.f32 2.0, %v38_v14  ;;  %v536_v49 = vmul.f32 2.0, %v37_v15  ;;  %vm298_vm2 = vcmask 1046528   ;;  %vm249_vm3 = vcmask 1040384   ;;  %s504_s21 = smov [#allocation5]  }
  0x1a   :  { %vm411_vm4 = vcmask 130048   ;;  %s433_s22 = sshll.u32 %s504_s21, 4  ;;  %s434_s22 = int_to_ptr.vmem [resolvable:$true] %s433_s22 }
  0x1b   :  { %s473_s23 = scalar_lea.vmem %s434_s22, 2048  ;;  %p478_p9 = scmp.lt.s32.totalorder %s434_s22, %s434_s22 }
  0x1c   :  { %65 = vrot.lane.b32.xlu1 %v28_v4, %s502_s20  ;;  %63 = vrot.lane.b32.xlu0 %v27_v5, %s502_s20  ;;  %p474_p8 = scmp.ne.s32.totalorder %s434_s22, %s473_s23  ;;  %p479_p10 = scmp.lt.s32.totalorder %s473_s23, %s473_s23 }
  0x1e   :  { %p480_p11 = por %p479_p10, %p478_p9 }
  0x20   :  { %69 = vrot.lane.b32.xlu1 %v30_v6, %s502_s20  ;;  %67 = vrot.lane.b32.xlu0 %v29_v7, %s502_s20  ;;  %p481_p12 = pnand %p480_p11, %p474_p8 }
  0x24   :  { %73 = vrot.lane.b32.xlu1 %v32_v8, %s502_s20  ;;  %71 = vrot.lane.b32.xlu0 %v31_v9, %s502_s20 }
  0x28   :  { %77 = vrot.lane.b32.xlu1 %v34_v10, %s502_s20  ;;  %75 = vrot.lane.b32.xlu0 %v33_v11, %s502_s20 }
  0x2c   :  { %81 = vrot.lane.b32.xlu1 %v36_v12, %s502_s20  ;;  %79 = vrot.lane.b32.xlu0 %v35_v13, %s502_s20 }
  0x30   :  { %85 = vrot.lane.b32.xlu1 %v38_v14, %s502_s20  ;;  %83 = vrot.lane.b32.xlu0 %v37_v15, %s502_s20 }
  0x34   :  { %122 = vrot.lane.b32.xlu1 %v24_v3, %s503_s0  ;;  %120 = vrot.lane.b32.xlu0 %v23_v1, %s503_s0 }
  0x38   :  { %126 = vrot.lane.b32.xlu1 %v26_v2, %s503_s0  ;;  %124 = vrot.lane.b32.xlu0 %v25_v0, %s503_s0 }
  0x3c   :  { %130 = vrot.lane.b32.xlu1 %v28_v4, %s503_s0  ;;  %128 = vrot.lane.b32.xlu0 %v27_v5, %s503_s0 }
  0x40   :  { %134 = vrot.lane.b32.xlu1 %v30_v6, %s503_s0  ;;  %132 = vrot.lane.b32.xlu0 %v29_v7, %s503_s0 }
  0x44   :  { %138 = vrot.lane.b32.xlu1 %v32_v8, %s503_s0  ;;  %136 = vrot.lane.b32.xlu0 %v31_v9, %s503_s0 }
  0x48   :  { %142 = vrot.lane.b32.xlu1 %v34_v10, %s503_s0  ;;  %140 = vrot.lane.b32.xlu0 %v33_v11, %s503_s0 }
  0x4c   :  { %146 = vrot.lane.b32.xlu1 %v36_v12, %s503_s0  ;;  %144 = vrot.lane.b32.xlu0 %v35_v13, %s503_s0 }
  0x50   :  { %150 = vrot.lane.b32.xlu1 %v38_v14, %s503_s0  ;;  %148 = vrot.lane.b32.xlu0 %v37_v15, %s503_s0 }
  0x86   :  { %v60_v16 = vpop.permute.xlu1 %59  ;;  %v56_v17 = vpop.permute.xlu0 %55 }
  0x87   :  { %v106_v42 = vsel %vm103_vm0, 0.0, %v60_v16  ;;  %v104_v43 = vsel %vm103_vm0, 0.0, %v56_v17 }
  0x88   :  { %v203_v54 = vadd.f32 %v187_v28, %v106_v42  ;;  %v201_v55 = vadd.f32 %v185_v29, %v104_v43 }
  0x8a   :  { %v62_v18 = vpop.permute.xlu1 %61  ;;  %v58_v19 = vpop.permute.xlu0 %57 }
  0x8b   :  { %v107_v46 = vsel %vm103_vm0, 0.0, %v62_v18  ;;  %v105_v47 = vsel %vm103_vm0, 0.0, %v58_v19 }
  0x8c   :  { %v204_v57 = vadd.f32 %v188_v30, %v107_v46  ;;  %v202_v58 = vadd.f32 %v186_v31, %v105_v47 }
  0x8e   :  { %v66_v20 = vpop.permute.xlu1 %65  ;;  %v64_v21 = vpop.permute.xlu0 %63 }
  0x8f   :  { %v109_v50 = vsel %vm103_vm0, 0.0, %v66_v20  ;;  %v108_v51 = vsel %vm103_vm0, 0.0, %v64_v21 }
  0x90   :  { %v206_v61 = vadd.f32 %v190_v32, %v109_v50  ;;  %v543_v62 = vadd.f32 %v189_v33, %v108_v51 }
  0x92   :  { %v70_v22 = vpop.permute.xlu1 %69  ;;  %v68_v23 = vpop.permute.xlu0 %67 }
  0x93   :  { %v111_v56 = vsel %vm103_vm0, 0.0, %v70_v22  ;;  %v110_v59 = vsel %vm103_vm0, 0.0, %v68_v23 }
  0x94   :  { %v547_v1 = vadd.f32 %v192_v34, %v111_v56  ;;  %v552_v7 = vadd.f32 %v191_v35, %v110_v59 }
  0x96   :  { %v74_v24 = vpop.permute.xlu1 %73  ;;  %v72_v25 = vpop.permute.xlu0 %71 }
  0x97   :  { %v113_v60 = vsel %vm103_vm0, 0.0, %v74_v24  ;;  %v112_v63 = vsel %vm103_vm0, 0.0, %v72_v25 }
  0x98   :  { %v554_v8 = vadd.f32 %v194_v38, %v113_v60  ;;  %v558_v11 = vadd.f32 %v193_v39, %v112_v63 }
  0x9a   :  { %v78_v26 = vpop.permute.xlu1 %77  ;;  %v76_v27 = vpop.permute.xlu0 %75 }
  0x9b   :  { %v115_v0 = vsel %vm103_vm0, 0.0, %v78_v26  ;;  %v114_v2 = vsel %vm103_vm0, 0.0, %v76_v27 }
  0x9c   :  { %v560_v12 = vadd.f32 %v196_v40, %v115_v0  ;;  %v562_v15 = vadd.f32 %v195_v41, %v114_v2 }
  0x9e   :  { %v82_v36 = vpop.permute.xlu1 %81  ;;  %v80_v37 = vpop.permute.xlu0 %79 }
  0x9f   :  { %v117_v3 = vsel %vm103_vm0, 0.0, %v82_v36  ;;  %v116_v4 = vsel %vm103_vm0, 0.0, %v80_v37 }
  0xa0   :  { %v564_v16 = vadd.f32 %v198_v44, %v117_v3  ;;  %v566_v17 = vadd.f32 %v197_v45, %v116_v4 }
  0xa2   :  { %v86_v52 = vpop.permute.xlu1 %85  ;;  %v84_v53 = vpop.permute.xlu0 %83 }
  0xa3   :  { %v119_v18 = vsel %vm103_vm0, 0.0, %v86_v52  ;;  %v572_v29 = vsel %vm103_vm0, 0.0, %v84_v53 }
  0xa4   :  { %v579_v47 = vadd.f32 %v534_v48, %v119_v18 }
  0xa6   :  { %v123_v5 = vpop.permute.xlu1 %122  ;;  %v121_v6 = vpop.permute.xlu0 %120 }
  0xa7   :  { %v170_v9 = vsel %vm168_vm1, %v123_v5, 0.0  ;;  %v169_v10 = vsel %vm168_vm1, %v121_v6, 0.0 }
  0xa8   :  { %v218_v13 = vadd.f32 %v202_v58, %v170_v9  ;;  %v217_v14 = vadd.f32 %v201_v55, %v169_v10 }
  0xaa   :  { %v251_v19 = vrot.slane %v218_v13, 7  ;;  %v300_v20 = vrot.slane %v218_v13, 1  ;;  %v348_v21 = vmul.f32 2.0, %v218_v13  ;;  %v250_v22 = vrot.slane %v217_v14, 7  ;;  %v127_v23 = vpop.permute.xlu1 %126  ;;  %v125_v24 = vpop.permute.xlu0 %124 }
  0xab   :  { %v299_v25 = vrot.slane %v217_v14, 1  ;;  %v347_v26 = vmul.f32 2.0, %v217_v14  ;;  %v172_v27 = vsel %vm168_vm1, %v127_v23, 0.0  ;;  %v171_v28 = vsel %vm168_vm1, %v125_v24, 0.0 }
  0xac   :  { %v252_v30 = vsel %vm249_vm3, %v250_v22, %v251_v19  ;;  %v290_v31 = vsel %vm249_vm3, 0.0, %v250_v22  ;;  %v220_v32 = vadd.f32 %v204_v57, %v172_v27  ;;  %v219_v36 = vadd.f32 %v203_v54, %v171_v28 }
  0xad   :  { %v301_v33 = vsel %vm298_vm2, %v299_v25, %v300_v20  ;;  %v363_v34 = vadd.f32 %v347_v26, %v290_v31  ;;  %v364_v35 = vadd.f32 %v348_v21, %v252_v30  ;;  %v339_v37 = vsel %vm298_vm2, %v300_v20, 0.0 }
  0xae   :  { %v254_v38 = vrot.slane %v220_v32, 7  ;;  %v303_v39 = vrot.slane %v220_v32, 1  ;;  %v350_v40 = vmul.f32 2.0, %v220_v32  ;;  %v131_v41 = vpop.permute.xlu1 %130  ;;  %v129_v42 = vpop.permute.xlu0 %128  ;;  %v253_v45 = vrot.slane %v219_v36, 7 }
  0xaf   :  { %v379_v43 = vadd.f32 %v363_v34, %v301_v33  ;;  %v380_v44 = vadd.f32 %v364_v35, %v339_v37  ;;  %v302_v46 = vrot.slane %v219_v36, 1  ;;  %v349_v50 = vmul.f32 2.0, %v219_v36 }
  0xb0   :  { %v174_v51 = vsel %vm168_vm1, %v131_v41, 0.0  ;;  %v173_v52 = vsel %vm168_vm1, %v129_v42, 0.0  ;;  %v255_v55 = vsel %vm249_vm3, %v253_v45, %v254_v38  ;;  %v291_v56 = vsel %vm249_vm3, 0.0, %v253_v45 }
  0xb1   :  { %v395_v53 = vmul.f32 0.05, %v379_v43  ;;  %v396_v54 = vmul.f32 0.05, %v380_v44  ;;  %v304_v57 = vsel %vm298_vm2, %v302_v46, %v303_v39  ;;  %v365_v58 = vadd.f32 %v349_v50, %v291_v56 }
  0xb2   :  { %v366_v59 = vadd.f32 %v350_v40, %v255_v55  ;;  %v222_v60 = vadd.f32 %v206_v61, %v174_v51  ;;  %v135_v63 = vpop.permute.xlu1 %134  ;;  %v133_v0 = vpop.permute.xlu0 %132  ;;  %v340_v48 = vsel %vm298_vm2, %v303_v39, 0.0  ;;  %v221_v2 = vadd.f32 %v543_v62, %v173_v52 }
  0xb3   :  { %412 = vst.msk [vmem:[#allocation5] sm:$0xff] %vm411_vm4, %v395_v53  ;;  %413 = vst.msk [vmem:[#allocation5 + $0x8] sm:$0xff] %vm411_vm4, %v396_v54  ;;  %v176_v3 = vsel %vm168_vm1, %v135_v63, 0.0  ;;  %v175_v4 = vsel %vm168_vm1, %v133_v0, 0.0  ;;  %v381_v5 = vadd.f32 %v365_v58, %v304_v57  ;;  %v602_v36 = vadd.f32 %v536_v49, %v572_v29 }
  0xb4   :  { %v382_v6 = vadd.f32 %v366_v59, %v340_v48  ;;  %v257_v9 = vrot.slane %v222_v60, 7  ;;  %v306_v10 = vrot.slane %v222_v60, 1  ;;  %v352_v13 = vmul.f32 2.0, %v222_v60 }
  0xb5   :  { %v256_v61 = vrot.slane %v221_v2, 7  ;;  %v305_v14 = vrot.slane %v221_v2, 1  ;;  %v351_v18 = vmul.f32 2.0, %v221_v2  ;;  %v397_v19 = vmul.f32 0.05, %v381_v5 }
  0xb6   :  { %v398_v20 = vmul.f32 0.05, %v382_v6  ;;  %v341_v21 = vsel %vm298_vm2, %v306_v10, 0.0  ;;  %v224_v22 = vadd.f32 %v547_v1, %v176_v3  ;;  %v139_v23 = vpop.permute.xlu1 %138  ;;  %v137_v62 = vpop.permute.xlu0 %136  ;;  %v223_v27 = vadd.f32 %v552_v7, %v175_v4 }
  0xb7   :  { %v258_v24 = vsel %vm249_vm3, %v256_v61, %v257_v9  ;;  %v292_v25 = vsel %vm249_vm3, 0.0, %v256_v61  ;;  %v307_v26 = vsel %vm298_vm2, %v305_v14, %v306_v10  ;;  %414 = vst.msk [vmem:[#allocation5 + $0x10] sm:$0xff] %vm411_vm4, %v397_v19  ;;  %v178_v7 = vsel %vm168_vm1, %v139_v23, 0.0 }
  0xb8   :  { %415 = vst.msk [vmem:[#allocation5 + $0x18] sm:$0xff] %vm411_vm4, %v398_v20  ;;  %v367_v28 = vadd.f32 %v351_v18, %v292_v25  ;;  %v368_v30 = vadd.f32 %v352_v13, %v258_v24  ;;  %v260_v31 = vrot.slane %v224_v22, 7  ;;  %v309_v32 = vrot.slane %v224_v22, 1 }
  0xb9   :  { %v354_v33 = vmul.f32 2.0, %v224_v22  ;;  %v259_v1 = vrot.slane %v223_v27, 7  ;;  %v308_v34 = vrot.slane %v223_v27, 1  ;;  %v353_v35 = vmul.f32 2.0, %v223_v27 }
  0xba   :  { %v383_v37 = vadd.f32 %v367_v28, %v307_v26  ;;  %v384_v38 = vadd.f32 %v368_v30, %v341_v21  ;;  %v143_v39 = vpop.permute.xlu1 %142  ;;  %v141_v40 = vpop.permute.xlu0 %140  ;;  %v226_v44 = vadd.f32 %v554_v8, %v178_v7  ;;  %v342_v49 = vsel %vm298_vm2, %v309_v32, 0.0 }
  0xbb   :  { %v261_v41 = vsel %vm249_vm3, %v259_v1, %v260_v31  ;;  %v293_v42 = vsel %vm249_vm3, 0.0, %v259_v1  ;;  %v310_v43 = vsel %vm298_vm2, %v308_v34, %v309_v32  ;;  %v177_v53 = vsel %vm168_vm1, %v137_v62, 0.0 }
  0xbc   :  { %v399_v45 = vmul.f32 0.05, %v383_v37  ;;  %v400_v46 = vmul.f32 0.05, %v384_v38  ;;  %v369_v50 = vadd.f32 %v353_v35, %v293_v42  ;;  %v370_v51 = vadd.f32 %v354_v33, %v261_v41 }
  0xbd   :  { %v263_v29 = vrot.slane %v226_v44, 7  ;;  %v312_v52 = vrot.slane %v226_v44, 1  ;;  %v225_v56 = vadd.f32 %v558_v11, %v177_v53  ;;  %v180_v8 = vsel %vm168_vm1, %v143_v39, 0.0 }
  0xbe   :  { %416 = vst.msk [vmem:[#allocation5 + $0x20] sm:$0xff] %vm411_vm4, %v399_v45  ;;  %417 = vst.msk [vmem:[#allocation5 + $0x28] sm:$0xff] %vm411_vm4, %v400_v46  ;;  %v385_v54 = vadd.f32 %v369_v50, %v310_v43  ;;  %v386_v55 = vadd.f32 %v370_v51, %v342_v49  ;;  %v147_v57 = vpop.permute.xlu1 %146  ;;  %v356_v58 = vmul.f32 2.0, %v226_v44  ;;  %v228_v59 = vadd.f32 %v560_v12, %v180_v8  ;;  %v145_v0 = vpop.permute.xlu0 %144 }
  0xbf   :  { %v179_v60 = vsel %vm168_vm1, %v141_v40, 0.0  ;;  %v182_v63 = vsel %vm168_vm1, %v147_v57, 0.0  ;;  %v262_v3 = vrot.slane %v225_v56, 7  ;;  %v311_v4 = vrot.slane %v225_v56, 1 }
  0xc0   :  { %v401_v48 = vmul.f32 0.05, %v385_v54  ;;  %v402_v2 = vmul.f32 0.05, %v386_v55  ;;  %v343_v5 = vsel %vm298_vm2, %v312_v52, 0.0  ;;  %v355_v6 = vmul.f32 2.0, %v225_v56 }
  0xc1   :  { %v266_v9 = vrot.slane %v228_v59, 7  ;;  %v315_v11 = vrot.slane %v228_v59, 1  ;;  %v264_v12 = vsel %vm249_vm3, %v262_v3, %v263_v29  ;;  %v294_v10 = vsel %vm249_vm3, 0.0, %v262_v3 }
  0xc2   :  { %418 = vst.msk [vmem:[#allocation5 + $0x30] sm:$0xff] %vm411_vm4, %v401_v48  ;;  %419 = vst.msk [vmem:[#allocation5 + $0x38] sm:$0xff] %vm411_vm4, %v402_v2  ;;  %v313_v13 = vsel %vm298_vm2, %v311_v4, %v312_v52  ;;  %v227_v61 = vadd.f32 %v562_v15, %v179_v60  ;;  %v371_v14 = vadd.f32 %v355_v6, %v294_v10  ;;  %v358_v19 = vmul.f32 2.0, %v228_v59  ;;  %v151_v28 = vpop.permute.xlu1 %150  ;;  %v149_v30 = vpop.permute.xlu0 %148 }
  0xc3   :  { %v372_v18 = vadd.f32 %v356_v58, %v264_v12  ;;  %v230_v20 = vadd.f32 %v564_v16, %v182_v63  ;;  %v344_v21 = vsel %vm298_vm2, %v315_v11, 0.0  ;;  %v181_v27 = vsel %vm168_vm1, %v145_v0, 0.0 }
  0xc4   :  { %v265_v22 = vrot.slane %v227_v61, 7  ;;  %v314_v23 = vrot.slane %v227_v61, 1  ;;  %v357_v62 = vmul.f32 2.0, %v227_v61  ;;  %v387_v24 = vadd.f32 %v371_v14, %v313_v13 }
  0xc5   :  { %v388_v25 = vadd.f32 %v372_v18, %v343_v5  ;;  %v269_v26 = vrot.slane %v230_v20, 7  ;;  %v318_v33 = vrot.slane %v230_v20, 1  ;;  %v360_v37 = vmul.f32 2.0, %v230_v20 }
  0xc6   :  { %v267_v31 = vsel %vm249_vm3, %v265_v22, %v266_v9  ;;  %v295_v15 = vsel %vm249_vm3, 0.0, %v265_v22  ;;  %v316_v32 = vsel %vm298_vm2, %v314_v23, %v315_v11  ;;  %v403_v16 = vmul.f32 0.05, %v387_v24 }
  0xc7   :  { %v404_v1 = vmul.f32 0.05, %v388_v25  ;;  %v373_v34 = vadd.f32 %v357_v62, %v295_v15  ;;  %v374_v35 = vadd.f32 %v358_v19, %v267_v31  ;;  %v229_v38 = vadd.f32 %v566_v17, %v181_v27 }
  0xc8   :  { %v184_v7 = vsel %vm168_vm1, %v151_v28, 0.0  ;;  %v183_v39 = vsel %vm168_vm1, %v149_v30, 0.0  ;;  %420 = vst.msk [vmem:[#allocation5 + $0x40] sm:$0xff] %vm411_vm4, %v403_v16  ;;  %v345_v56 = vsel %vm298_vm2, %v318_v33, 0.0 }
  0xc9   :  { %421 = vst.msk [vmem:[#allocation5 + $0x48] sm:$0xff] %vm411_vm4, %v404_v1  ;;  %v389_v40 = vadd.f32 %v373_v34, %v316_v32  ;;  %v390_v41 = vadd.f32 %v374_v35, %v344_v21  ;;  %v232_v42 = vadd.f32 %v579_v47, %v184_v7  ;;  %v231_v43 = vadd.f32 %v602_v36, %v183_v39 }
  0xca   :  { %v268_v44 = vrot.slane %v229_v38, 7  ;;  %v317_v45 = vrot.slane %v229_v38, 1  ;;  %v359_v46 = vmul.f32 2.0, %v229_v38 }
  0xcb   :  { %v405_v50 = vmul.f32 0.05, %v389_v40  ;;  %v406_v51 = vmul.f32 0.05, %v390_v41  ;;  %v272_v17 = vrot.slane %v232_v42, 7  ;;  %v321_v49 = vrot.slane %v232_v42, 1 }
  0xcc   :  { %v270_v29 = vsel %vm249_vm3, %v268_v44, %v269_v26  ;;  %v296_v52 = vsel %vm249_vm3, 0.0, %v268_v44  ;;  %v319_v53 = vsel %vm298_vm2, %v317_v45, %v318_v33  ;;  %v362_v54 = vmul.f32 2.0, %v232_v42 }
  0xcd   :  { %422 = vst.msk [vmem:[#allocation5 + $0x50] sm:$0xff] %vm411_vm4, %v405_v50  ;;  %423 = vst.msk [vmem:[#allocation5 + $0x58] sm:$0xff] %vm411_vm4, %v406_v51  ;;  %v375_v47 = vadd.f32 %v359_v46, %v296_v52  ;;  %v376_v36 = vadd.f32 %v360_v37, %v270_v29  ;;  %v271_v55 = vrot.slane %v231_v43, 7  ;;  %v320_v8 = vrot.slane %v231_v43, 1 }
  0xce   :  { %v361_v57 = vmul.f32 2.0, %v231_v43  ;;  %v346_v5 = vsel %vm298_vm2, %v321_v49, 0.0 }
  0xcf   :  { %v391_v58 = vadd.f32 %v375_v47, %v319_v53  ;;  %v392_v59 = vadd.f32 %v376_v36, %v345_v56  ;;  %v273_v60 = vsel %vm249_vm3, %v271_v55, %v272_v17  ;;  %v297_v63 = vsel %vm249_vm3, 0.0, %v271_v55 }
  0xd0   :  { %v322_v0 = vsel %vm298_vm2, %v320_v8, %v321_v49  ;;  %v377_v48 = vadd.f32 %v361_v57, %v297_v63  ;;  %v378_v2 = vadd.f32 %v362_v54, %v273_v60 }
  0xd1   :  { %v407_v3 = vmul.f32 0.05, %v391_v58  ;;  %v408_v4 = vmul.f32 0.05, %v392_v59 }
  0xd2   :  { %v393_v6 = vadd.f32 %v377_v48, %v322_v0  ;;  %v394_v9 = vadd.f32 %v378_v2, %v346_v5 }
  0xd3   :  { %424 = vst.msk [vmem:[#allocation5 + $0x60] sm:$0xff] %vm411_vm4, %v407_v3  ;;  %425 = vst.msk [vmem:[#allocation5 + $0x68] sm:$0xff] %vm411_vm4, %v408_v4 }
  0xd4   :  { %v409_v11 = vmul.f32 0.05, %v393_v6  ;;  %v410_v12 = vmul.f32 0.05, %v394_v9 }
  0xd6   :  { %426 = vst.msk [vmem:[#allocation5 + $0x70] sm:$0xff] %vm411_vm4, %v409_v11  ;;  %427 = vst.msk [vmem:[#allocation5 + $0x78] sm:$0xff] %vm411_vm4, %v410_v12 }
  0xd7   :  { %484 = shalt.err (!%p481_p12)
}
  0xd8   :  { %s485_s26 = scalar_lea.hbm %s668_s1, 2048 }
  0xd9   :  { %p486_p13 = scmp.ne.s32.totalorder %s668_s1, %s485_s26  ;;  %p489_p0 = scmp.lt.u32.totalorder %s485_s26, %s668_s1 }
  0xdb   :  { %p491_p1 = pnand %p489_p0, %p486_p13 }
  0xdd   :  { %494 = shalt.err (!%p491_p1)
}
  0xde   :  { %439 = dma.vmem_to_hbm [thread:$0]  %s434_s22, 2048, %s668_s1, [#allocation4], %s500_s16, %s500_s16, %s501_s17  }
  0xdf   :  { %497 = dma.done.wait [#allocation4], 2048  }
  0xe0   :  { %498 = vsyncadd [#allocation4], 4294965248 }
  0xe1   :  { %443 = vsyncpa [#allocation3], 1 }
  0xe2   :  { %444 = vsyncpa [#allocation4], 1 }

</bundles_post_ra>
